<compile_context>
chip_gen: v7x
topology: tpu7x:2x2x1
jax: 0.10.0
libtpu: 0.0.40
codegen_flags: <defaults>
</compile_context>

<pallas_src>
import jax
import jax.numpy as jnp
from jax.experimental import pallas as pl
from jax.experimental.pallas import tpu as pltpu

INPUT_SIZE = 28 * 28    # 784, kept unpadded (masked final MXU K chunk < extra DMA)
H1 = 100
H2 = 50
NUM_CLASSES = 10
H_PAD = 128             # hidden dims lane-padded 100/50 -> 128 (zero padding, exact no-op)
N_OUT_PAD = 128         # lane-dense output width (sliced back to 10 in wrapper)
BN_EPS = 1e-5


def _batchnorm_train(h, gamma, beta):
    # BatchNorm1d, training mode: biased batch variance, one-pass moments.
    mean = jnp.mean(h, axis=0, keepdims=True)
    var = jnp.maximum(jnp.mean(h * h, axis=0, keepdims=True) - mean * mean, 0.0)
    return (h - mean) * jax.lax.rsqrt(var + BN_EPS) * gamma + beta


def firstnet_kernel(x_ref, w0_ref, w1_ref, w2_ref, vec_ref, o_ref):
    # vec_ref rows: 0=gamma1, 1=beta1, 2=gamma2, 3=beta2, 4=b2, 5..7 unused.
    x = x_ref[...].astype(jnp.bfloat16)                                    # [B, 784]

    # fc_0 (bias cancels under training-mode BN) -> bn1 -> relu
    h = jnp.dot(x, w0_ref[...], preferred_element_type=jnp.float32)        # [B, 128] f32
    h = _batchnorm_train(h, vec_ref[0:1, :], vec_ref[1:2, :])
    h = jnp.maximum(h, 0.0)

    # fc_1 (bias cancels under training-mode BN) -> bn2 -> relu
    h = jnp.dot(h.astype(jnp.bfloat16), w1_ref[...],
                preferred_element_type=jnp.float32)                        # [B, 128] f32
    h = _batchnorm_train(h, vec_ref[2:3, :], vec_ref[3:4, :])
    h = jnp.maximum(h, 0.0)

    # fc_2 (output lane-padded to 128; padded columns are all-zero logits)
    logits = jnp.dot(h.astype(jnp.bfloat16), w2_ref[...],
                     preferred_element_type=jnp.float32) + vec_ref[4:5, :]  # [B, 128]

    # log_softmax over dim=0 (batch axis) — matches func.log_softmax(x, 0)
    m = jnp.max(logits, axis=0, keepdims=True)
    lse = m + jnp.log(jnp.sum(jnp.exp(logits - m), axis=0, keepdims=True))
    o_ref[...] = (logits - lse).astype(o_ref.dtype)


def prepare_params(params):
    """One-time parameter preprocessing. Call once and reuse across forward calls.

    - Drops b0/b1 (per-column constant bias cancels exactly under training-mode
      BatchNorm's batch-mean subtraction).  # only valid for training-mode BN
    - Lane-pads hidden dims 100/50 -> 128 and output 10 -> 128 with zeros
      (padded gamma=1, beta=0, zero weight rows/cols => padded channels stay 0).
    - Casts matmul operands to bf16 (kernel accumulates in f32 on the MXU);
      BN / bias vectors stay f32.
    - Packs the five tiny per-channel vectors into one [8, 128] f32 slab so the
      kernel takes 5 inputs (5 DMAs) instead of 9.
    """
    (w0, b0, g1, be1, w1, b1, g2, be2, w2, b2) = params
    del b0, b1  # cancel exactly under training-mode BatchNorm

    w0_p = jnp.pad(w0.astype(jnp.bfloat16), ((0, 0), (0, H_PAD - H1)))
    w1_p = jnp.pad(w1.astype(jnp.bfloat16), ((0, H_PAD - H1), (0, H_PAD - H2)))
    w2_p = jnp.pad(w2.astype(jnp.bfloat16),
                   ((0, H_PAD - H2), (0, N_OUT_PAD - NUM_CLASSES)))

    def pad_vec(v, fill):
        v = v.astype(jnp.float32).reshape(1, -1)
        return jnp.pad(v, ((0, 0), (0, 128 - v.shape[1])), constant_values=fill)

    vec = jnp.concatenate([
        pad_vec(g1, 1.0),                  # gamma1 (padded gamma=1: finite, harmless)
        pad_vec(be1, 0.0),                 # beta1  (padded beta=0: padded channels stay 0)
        pad_vec(g2, 1.0),                  # gamma2
        pad_vec(be2, 0.0),                 # beta2
        pad_vec(b2, 0.0),                  # fc_2 bias (padded logits stay 0)
        jnp.zeros((3, 128), jnp.float32),  # round up to a full (8, 128) tile
    ], axis=0)

    return (w0_p, w1_p, w2_p, vec)


def firstnet_forward(x, prepared):
    """x: anything flattening to [-1, 784] (e.g. [B, 1, 28, 28]).
    prepared: cached output of prepare_params()."""
    w0_p, w1_p, w2_p, vec = prepared
    x2d = x.reshape(-1, INPUT_SIZE).astype(jnp.float32)
    B = x2d.shape[0]

    inputs = (x2d, w0_p, w1_p, w2_p, vec)

    flops = 2 * B * (INPUT_SIZE * H_PAD + H_PAD * H_PAD + H_PAD * N_OUT_PAD)
    transcendentals = B * N_OUT_PAD + 2 * H_PAD  # softmax exps, per-feature rsqrt
    bytes_accessed = (sum(int(a.size) * a.dtype.itemsize for a in inputs)
                      + B * N_OUT_PAD * 4)

    def full_spec(a):
        return pl.BlockSpec(a.shape, lambda *_: (0,) * a.ndim)

    out_padded = pl.pallas_call(
        firstnet_kernel,
        out_shape=jax.ShapeDtypeStruct((B, N_OUT_PAD), jnp.float32),
        grid=(1,),
        in_specs=[full_spec(a) for a in inputs],
        out_specs=pl.BlockSpec((B, N_OUT_PAD), lambda *_: (0, 0)),
        compiler_params=pltpu.CompilerParams(
            dimension_semantics=("arbitrary",),
            # ~180 KB resident at small B; 32 MiB leaves headroom under v7x's
            # 64 MiB physical VMEM while still allowing B up to a few thousand.
            vmem_limit_bytes=32 * 1024 * 1024),
        cost_estimate=pl.CostEstimate(
            flops=flops,
            transcendentals=transcendentals,
            bytes_accessed=bytes_accessed),
    )(*inputs)

    return out_padded[:, :NUM_CLASSES]


def firstnet_reference(x, params):
    """Pure-JAX f32 reference (training-mode BN, biases included)."""
    (w0, b0, g1, be1, w1, b1, g2, be2, w2, b2) = params
    h = x.reshape(-1, INPUT_SIZE) @ w0 + b0
    mean = jnp.mean(h, axis=0, keepdims=True)
    var = jnp.mean((h - mean) ** 2, axis=0, keepdims=True)
    h = jnp.maximum((h - mean) * jax.lax.rsqrt(var + BN_EPS) * g1 + be1, 0.0)
    h = h @ w1 + b1
    mean = jnp.mean(h, axis=0, keepdims=True)
    var = jnp.mean((h - mean) ** 2, axis=0, keepdims=True)
    h = jnp.maximum((h - mean) * jax.lax.rsqrt(var + BN_EPS) * g2 + be2, 0.0)
    logits = h @ w2 + b2
    return jax.nn.log_softmax(logits, axis=0)


def init_params(key):
    """Deterministic synthetic parameters with PyTorch-like shapes.

    Linear weights stored transposed ([in, out]) relative to PyTorch's
    [out, in]; biases / BN params stored [1, N] for lane-major broadcast.
    """
    ks = jax.random.split(key, 8)

    def lin(kw, kb, fan_in, fan_out):
        bound = 1.0 / jnp.sqrt(jnp.float32(fan_in))
        w = jax.random.uniform(kw, (fan_in, fan_out), jnp.float32, -bound, bound)
        b = jax.random.uniform(kb, (1, fan_out), jnp.float32, -bound, bound)
        return w, b

    w0, b0 = lin(ks[0], ks[1], INPUT_SIZE, H1)
    w1, b1 = lin(ks[2], ks[3], H1, H2)
    w2, b2 = lin(ks[4], ks[5], H2, NUM_CLASSES)

    g1 = 1.0 + 0.1 * jax.random.normal(ks[6], (1, H1), jnp.float32)
    be1 = 0.1 * jax.random.normal(ks[7], (1, H1), jnp.float32)
    g2 = jnp.ones((1, H2), jnp.float32) * 0.9
    be2 = jnp.full((1, H2), 0.05, jnp.float32)

    return (w0, b0, g1, be1, w1, b1, g2, be2, w2, b2)


if __name__ == "__main__":
    key = jax.random.PRNGKey(0)
    k_x, k_p = jax.random.split(key)

    B = 8
    x = jax.random.normal(k_x, (B, 1, 28, 28), jnp.float32)   # NCHW, like MNIST
    params = init_params(k_p)

    prepared = prepare_params(params)          # one-time; reused across forward calls
    forward = jax.jit(firstnet_forward)

    out = forward(x, prepared)
    jax.block_until_ready(out)

    assert out.shape == (B, NUM_CLASSES)
    assert out.dtype == jnp.float32
    # log_softmax over dim 0 => each column's exps sum to 1.
    col_sums = jnp.sum(jnp.exp(out), axis=0)
    assert bool(jnp.all(jnp.abs(col_sums - 1.0) < 1e-4))
    # bf16-MXU / f32-accumulate path stays close to the full-f32 reference.
    ref = firstnet_reference(x, params)
    assert bool(jnp.max(jnp.abs(out - ref)) < 0.2)

    print("KERNEL_OK")
</pallas_src>

<mosaic_0001>
module attributes {stable_mosaic.version = 11 : i64} {
  func.func @firstnet_kernel(%arg0: i32, %arg1: memref<8x784xf32, #tpu.memory_space<vmem>>, %arg2: memref<784x128xbf16, #tpu.memory_space<vmem>>, %arg3: memref<128x128xbf16, #tpu.memory_space<vmem>>, %arg4: memref<128x128xbf16, #tpu.memory_space<vmem>>, %arg5: memref<8x128xf32, #tpu.memory_space<vmem>>, %arg6: memref<8x128xf32, #tpu.memory_space<vmem>>) attributes {dimension_semantics = [#tpu.dimension_semantics<arbitrary>], iteration_bounds = array<i64: 1>, scalar_prefetch = 0 : i64, scratch_operands = 0 : i64, tpu.core_type = #tpu.core_type<tc>, window_params = [{pipeline_mode = #tpu.pipeline_mode<synchronous>, transform_indices = @transform_0, window_bounds = array<i64: 8, 784>}, {pipeline_mode = #tpu.pipeline_mode<synchronous>, transform_indices = @transform_1, window_bounds = array<i64: 784, 128>}, {pipeline_mode = #tpu.pipeline_mode<synchronous>, transform_indices = @transform_2, window_bounds = array<i64: 128, 128>}, {pipeline_mode = #tpu.pipeline_mode<synchronous>, transform_indices = @transform_3, window_bounds = array<i64: 128, 128>}, {pipeline_mode = #tpu.pipeline_mode<synchronous>, transform_indices = @transform_4, window_bounds = array<i64: 8, 128>}, {pipeline_mode = #tpu.pipeline_mode<synchronous>, transform_indices = @transform_5, window_bounds = array<i64: 8, 128>}]} {
    %c0 = arith.constant 0 : index
    %c0_0 = arith.constant 0 : index
    %0 = vector.load %arg1[%c0, %c0_0] : memref<8x784xf32, #tpu.memory_space<vmem>>, vector<8x784xf32>
    %1 = arith.truncf %0 : vector<8x784xf32> to vector<8x784xbf16>
    %c0_1 = arith.constant 0 : index
    %c0_2 = arith.constant 0 : index
    %2 = vector.load %arg2[%c0_1, %c0_2] : memref<784x128xbf16, #tpu.memory_space<vmem>>, vector<784x128xbf16>
    %cst = arith.constant dense<0.000000e+00> : vector<8x128xf32>
    %3 = tpu.matmul %1, %2, %cst {dimension_numbers = #tpu.dot_dimension_numbers<[1], [0], [0], [1], [0, 0, 1, 1], [], []>} : vector<8x784xbf16>, vector<784x128xbf16>, vector<8x128xf32> -> vector<8x128xf32>
    %c0_3 = arith.constant 0 : index
    %c0_4 = arith.constant 0 : index
    %4 = vector.load %arg5[%c0_3, %c0_4] : memref<8x128xf32, #tpu.memory_space<vmem>>, vector<1x128xf32>
    %c1 = arith.constant 1 : index
    %c0_5 = arith.constant 0 : index
    %5 = vector.load %arg5[%c1, %c0_5] : memref<8x128xf32, #tpu.memory_space<vmem>>, vector<1x128xf32>
    %cst_6 = arith.constant dense<0.000000e+00> : vector<128xf32>
    %6 = vector.multi_reduction <add>, %3, %cst_6 [0] : vector<8x128xf32> to vector<128xf32>
    %7 = vector.shape_cast %6 : vector<128xf32> to vector<1x128xf32>
    %cst_7 = arith.constant 8.000000e+00 : f32
    %8 = vector.broadcast %cst_7 : f32 to vector<1x128xf32>
    %9 = arith.divf %7, %8 : vector<1x128xf32>
    %10 = arith.mulf %3, %3 : vector<8x128xf32>
    %cst_8 = arith.constant dense<0.000000e+00> : vector<128xf32>
    %11 = vector.multi_reduction <add>, %10, %cst_8 [0] : vector<8x128xf32> to vector<128xf32>
    %12 = vector.shape_cast %11 : vector<128xf32> to vector<1x128xf32>
    %cst_9 = arith.constant 8.000000e+00 : f32
    %13 = vector.broadcast %cst_9 : f32 to vector<1x128xf32>
    %14 = arith.divf %12, %13 : vector<1x128xf32>
    %15 = arith.mulf %9, %9 : vector<1x128xf32>
    %16 = arith.subf %14, %15 : vector<1x128xf32>
    %cst_10 = arith.constant 0.000000e+00 : f32
    %17 = vector.broadcast %cst_10 : f32 to vector<1x128xf32>
    %18 = arith.maximumf %16, %17 : vector<1x128xf32>
    %19 = vector.broadcast %9 : vector<1x128xf32> to vector<8x128xf32>
    %20 = arith.subf %3, %19 : vector<8x128xf32>
    %cst_11 = arith.constant 9.99999974E-6 : f32
    %21 = vector.broadcast %cst_11 : f32 to vector<1x128xf32>
    %22 = arith.addf %18, %21 : vector<1x128xf32>
    %23 = math.rsqrt %22 : vector<1x128xf32>
    %24 = vector.broadcast %23 : vector<1x128xf32> to vector<8x128xf32>
    %25 = arith.mulf %20, %24 : vector<8x128xf32>
    %26 = vector.broadcast %4 : vector<1x128xf32> to vector<8x128xf32>
    %27 = arith.mulf %25, %26 : vector<8x128xf32>
    %28 = vector.broadcast %5 : vector<1x128xf32> to vector<8x128xf32>
    %29 = arith.addf %27, %28 : vector<8x128xf32>
    %cst_12 = arith.constant 0.000000e+00 : f32
    %30 = vector.broadcast %cst_12 : f32 to vector<8x128xf32>
    %31 = arith.maximumf %29, %30 : vector<8x128xf32>
    %32 = arith.truncf %31 : vector<8x128xf32> to vector<8x128xbf16>
    %c0_13 = arith.constant 0 : index
    %c0_14 = arith.constant 0 : index
    %33 = vector.load %arg3[%c0_13, %c0_14] : memref<128x128xbf16, #tpu.memory_space<vmem>>, vector<128x128xbf16>
    %cst_15 = arith.constant dense<0.000000e+00> : vector<8x128xf32>
    %34 = tpu.matmul %32, %33, %cst_15 {dimension_numbers = #tpu.dot_dimension_numbers<[1], [0], [0], [1], [0, 0, 1, 1], [], []>} : vector<8x128xbf16>, vector<128x128xbf16>, vector<8x128xf32> -> vector<8x128xf32>
    %c2 = arith.constant 2 : index
    %c0_16 = arith.constant 0 : index
    %35 = vector.load %arg5[%c2, %c0_16] : memref<8x128xf32, #tpu.memory_space<vmem>>, vector<1x128xf32>
    %c3 = arith.constant 3 : index
    %c0_17 = arith.constant 0 : index
    %36 = vector.load %arg5[%c3, %c0_17] : memref<8x128xf32, #tpu.memory_space<vmem>>, vector<1x128xf32>
    %cst_18 = arith.constant dense<0.000000e+00> : vector<128xf32>
    %37 = vector.multi_reduction <add>, %34, %cst_18 [0] : vector<8x128xf32> to vector<128xf32>
    %38 = vector.shape_cast %37 : vector<128xf32> to vector<1x128xf32>
    %cst_19 = arith.constant 8.000000e+00 : f32
    %39 = vector.broadcast %cst_19 : f32 to vector<1x128xf32>
    %40 = arith.divf %38, %39 : vector<1x128xf32>
    %41 = arith.mulf %34, %34 : vector<8x128xf32>
    %cst_20 = arith.constant dense<0.000000e+00> : vector<128xf32>
    %42 = vector.multi_reduction <add>, %41, %cst_20 [0] : vector<8x128xf32> to vector<128xf32>
    %43 = vector.shape_cast %42 : vector<128xf32> to vector<1x128xf32>
    %cst_21 = arith.constant 8.000000e+00 : f32
    %44 = vector.broadcast %cst_21 : f32 to vector<1x128xf32>
    %45 = arith.divf %43, %44 : vector<1x128xf32>
    %46 = arith.mulf %40, %40 : vector<1x128xf32>
    %47 = arith.subf %45, %46 : vector<1x128xf32>
    %cst_22 = arith.constant 0.000000e+00 : f32
    %48 = vector.broadcast %cst_22 : f32 to vector<1x128xf32>
    %49 = arith.maximumf %47, %48 : vector<1x128xf32>
    %50 = vector.broadcast %40 : vector<1x128xf32> to vector<8x128xf32>
    %51 = arith.subf %34, %50 : vector<8x128xf32>
    %cst_23 = arith.constant 9.99999974E-6 : f32
    %52 = vector.broadcast %cst_23 : f32 to vector<1x128xf32>
    %53 = arith.addf %49, %52 : vector<1x128xf32>
    %54 = math.rsqrt %53 : vector<1x128xf32>
    %55 = vector.broadcast %54 : vector<1x128xf32> to vector<8x128xf32>
    %56 = arith.mulf %51, %55 : vector<8x128xf32>
    %57 = vector.broadcast %35 : vector<1x128xf32> to vector<8x128xf32>
    %58 = arith.mulf %56, %57 : vector<8x128xf32>
    %59 = vector.broadcast %36 : vector<1x128xf32> to vector<8x128xf32>
    %60 = arith.addf %58, %59 : vector<8x128xf32>
    %cst_24 = arith.constant 0.000000e+00 : f32
    %61 = vector.broadcast %cst_24 : f32 to vector<8x128xf32>
    %62 = arith.maximumf %60, %61 : vector<8x128xf32>
    %63 = arith.truncf %62 : vector<8x128xf32> to vector<8x128xbf16>
    %c0_25 = arith.constant 0 : index
    %c0_26 = arith.constant 0 : index
    %64 = vector.load %arg4[%c0_25, %c0_26] : memref<128x128xbf16, #tpu.memory_space<vmem>>, vector<128x128xbf16>
    %cst_27 = arith.constant dense<0.000000e+00> : vector<8x128xf32>
    %65 = tpu.matmul %63, %64, %cst_27 {dimension_numbers = #tpu.dot_dimension_numbers<[1], [0], [0], [1], [0, 0, 1, 1], [], []>} : vector<8x128xbf16>, vector<128x128xbf16>, vector<8x128xf32> -> vector<8x128xf32>
    %c4 = arith.constant 4 : index
    %c0_28 = arith.constant 0 : index
    %66 = vector.load %arg5[%c4, %c0_28] : memref<8x128xf32, #tpu.memory_space<vmem>>, vector<1x128xf32>
    %67 = vector.broadcast %66 : vector<1x128xf32> to vector<8x128xf32>
    %68 = arith.addf %65, %67 : vector<8x128xf32>
    %cst_29 = arith.constant dense<0xFF800000> : vector<128xf32>
    %69 = vector.multi_reduction <maximumf>, %68, %cst_29 [0] : vector<8x128xf32> to vector<128xf32>
    %70 = vector.shape_cast %69 : vector<128xf32> to vector<1x128xf32>
    %71 = vector.broadcast %70 : vector<1x128xf32> to vector<8x128xf32>
    %72 = arith.subf %68, %71 : vector<8x128xf32>
    %73 = math.exp %72 : vector<8x128xf32>
    %cst_30 = arith.constant dense<0.000000e+00> : vector<128xf32>
    %74 = vector.multi_reduction <add>, %73, %cst_30 [0] : vector<8x128xf32> to vector<128xf32>
    %75 = vector.shape_cast %74 : vector<128xf32> to vector<1x128xf32>
    %76 = math.log %75 : vector<1x128xf32>
    %77 = arith.addf %70, %76 : vector<1x128xf32>
    %78 = vector.broadcast %77 : vector<1x128xf32> to vector<8x128xf32>
    %79 = arith.subf %68, %78 : vector<8x128xf32>
    %c0_31 = arith.constant 0 : index
    %c0_32 = arith.constant 0 : index
    %80 = vector.load %arg6[%c0_31, %c0_32] : memref<8x128xf32, #tpu.memory_space<vmem>>, vector<8x128xf32>
    tpu.vector_store %arg6[%c0_31, %c0_32], %79 {strides = array<i32>} : memref<8x128xf32, #tpu.memory_space<vmem>>, vector<8x128xf32>,
    return
  }
  func.func @transform_0(%arg0: i32) -> (i32, i32) {
    %c0_i32 = arith.constant 0 : i32
    %c0_i32_0 = arith.constant 0 : i32
    %c0_i32_1 = arith.constant 0 : i32
    return %c0_i32, %c0_i32_0 : i32, i32
  }
  func.func @transform_1(%arg0: i32) -> (i32, i32) {
    %c0_i32 = arith.constant 0 : i32
    %c0_i32_0 = arith.constant 0 : i32
    %c0_i32_1 = arith.constant 0 : i32
    return %c0_i32, %c0_i32_0 : i32, i32
  }
  func.func @transform_2(%arg0: i32) -> (i32, i32) {
    %c0_i32 = arith.constant 0 : i32
    %c0_i32_0 = arith.constant 0 : i32
    %c0_i32_1 = arith.constant 0 : i32
    return %c0_i32, %c0_i32_0 : i32, i32
  }
  func.func @transform_3(%arg0: i32) -> (i32, i32) {
    %c0_i32 = arith.constant 0 : i32
    %c0_i32_0 = arith.constant 0 : i32
    %c0_i32_1 = arith.constant 0 : i32
    return %c0_i32, %c0_i32_0 : i32, i32
  }
  func.func @transform_4(%arg0: i32) -> (i32, i32) {
    %c0_i32 = arith.constant 0 : i32
    %c0_i32_0 = arith.constant 0 : i32
    %c0_i32_1 = arith.constant 0 : i32
    return %c0_i32, %c0_i32_0 : i32, i32
  }
  func.func @transform_5(%arg0: i32) -> (i32, i32) {
    %c0_i32 = arith.constant 0 : i32
    %c0_i32_0 = arith.constant 0 : i32
    %c0_i32_1 = arith.constant 0 : i32
    return %c0_i32, %c0_i32_0 : i32, i32
  }
}

</mosaic_0001>

<bundles_post_ra>
// kernel: firstnet_forward.1
= control target key start
LH: loop header
LB: loop body
LE: loop exit
PB: predicated region body
PF: predicated region fallthrough
CT: control target
= control target key end

     0   :  { %v1215_v41 = vmov 0.0   ;;  %vm1216_vm0 = vmmov 0   ;;  %vm428_vm1 = vcmask 130048   ;;  %s1514_s0 = inlined_call_operand.vmem [shape: f32[8,784], index: 0, kind: input, shape index: {}]   ;;  %s1515_s1 = inlined_call_operand.vmem [shape: bf16[784,128], index: 1, kind: input, shape index: {}]   ;;  %s1516_s2 = inlined_call_operand.vmem [shape: bf16[128,128], index: 2, kind: input, shape index: {}]   ;;  %s1517_s3 = inlined_call_operand.vmem [shape: bf16[128,128], index: 3, kind: input, shape index: {}]   ;;  %s1518_s4 = inlined_call_operand.vmem [shape: f32[8,128], index: 4, kind: input, shape index: {}]   ;;  %s1519_s5 = inlined_call_operand.hbm [shape: f32[8,128], index: 5, kind: output, shape index: {}]  }
   0x1   :  { %v1118_v0 = vld [vmem:[%s1515_s1 + $0x40] sm:$0xff]   ;;  %v1122_v4 = vld [vmem:[%s1515_s1 + $0x48] sm:$0xff]   ;;  %v1126_v8 = vld [vmem:[%s1515_s1 + $0x50] sm:$0xff]  }
   0x2   :  { %v1119_v1 = vld [vmem:[%s1515_s1 + $0xc0] sm:$0xff]   ;;  %983 = vmatprep.subr.bf16.mxu0 %v1118_v0  ;;  %v1123_v5 = vld [vmem:[%s1515_s1 + $0xc8] sm:$0xff]   ;;  %v1127_v9 = vld [vmem:[%s1515_s1 + $0xd0] sm:$0xff]  }
   0x3   :  { %v1120_v2 = vld [vmem:[%s1515_s1] sm:$0xff]   ;;  %1005 = vmatprep.subr.bf16.mxu1 %v1119_v1  ;;  %v1124_v6 = vld [vmem:[%s1515_s1 + $0x8] sm:$0xff]   ;;  %v1128_v10 = vld [vmem:[%s1515_s1 + $0x10] sm:$0xff]  }
   0x4   :  { %v1121_v3 = vld [vmem:[%s1515_s1 + $0x80] sm:$0xff]   ;;  %984 = vmatpush3.bf16.msra.mxu0 %v1120_v2  ;;  %v1125_v7 = vld [vmem:[%s1515_s1 + $0x88] sm:$0xff]   ;;  %v1129_v11 = vld [vmem:[%s1515_s1 + $0x90] sm:$0xff]  }
   0x5   :  { %1006 = vmatpush3.bf16.msra.mxu1 %v1121_v3  ;;  %985 = vmatprep.subr.bf16.mxu0 %v1122_v4  ;;  %v1130_v12 = vld [vmem:[%s1515_s1 + $0x58] sm:$0xff]   ;;  %v1134_v16 = vld [vmem:[%s1515_s1 + $0x60] sm:$0xff]   ;;  %v1138_v20 = vld [vmem:[%s1515_s1 + $0x68] sm:$0xff]  }
   0x6   :  { %1007 = vmatprep.subr.bf16.mxu1 %v1123_v5  ;;  %v1131_v13 = vld [vmem:[%s1515_s1 + $0xd8] sm:$0xff]   ;;  %v1135_v17 = vld [vmem:[%s1515_s1 + $0xe0] sm:$0xff]   ;;  %v1139_v21 = vld [vmem:[%s1515_s1 + $0xe8] sm:$0xff]  }
   0x7   :  { %v1132_v14 = vld [vmem:[%s1515_s1 + $0x18] sm:$0xff]   ;;  %v1136_v18 = vld [vmem:[%s1515_s1 + $0x20] sm:$0xff]   ;;  %v1140_v22 = vld [vmem:[%s1515_s1 + $0x28] sm:$0xff]  }
   0x8   :  { %986 = vmatpush3.bf16.msra.mxu0 %v1124_v6  ;;  %v1133_v15 = vld [vmem:[%s1515_s1 + $0x98] sm:$0xff]   ;;  %v1137_v19 = vld [vmem:[%s1515_s1 + $0xa0] sm:$0xff]   ;;  %v1141_v23 = vld [vmem:[%s1515_s1 + $0xa8] sm:$0xff]  }
   0x9   :  { %1008 = vmatpush3.bf16.msra.mxu1 %v1125_v7  ;;  %987 = vmatprep.subr.bf16.mxu0 %v1126_v8  ;;  %v1142_v24 = vld [vmem:[%s1515_s1 + $0x70] sm:$0xff]   ;;  %v1146_v28 = vld [vmem:[%s1515_s1 + $0x78] sm:$0xff]   ;;  %v23_v32 = vld [vmem:[%s1514_s0 + $0x8] sm:$0xff] }
   0xa   :  { %1009 = vmatprep.subr.bf16.mxu1 %v1127_v9  ;;  %v1143_v25 = vld [vmem:[%s1515_s1 + $0xf0] sm:$0xff]   ;;  %v1147_v29 = vld [vmem:[%s1515_s1 + $0xf8] sm:$0xff]   ;;  %v22_v34 = vld [vmem:[%s1514_s0] sm:$0xff]  ;;  %v30_v35 = vpack.c.bf16 %v23_v32, %v23_v32 }
   0xb   :  { %v1144_v26 = vld [vmem:[%s1515_s1 + $0x30] sm:$0xff]   ;;  %v1148_v30 = vld [vmem:[%s1515_s1 + $0x38] sm:$0xff]   ;;  %v29_v37 = vpack.c.bf16 %v22_v34, %v22_v34  ;;  %v1150_v40 = vld [vmem:[%s1515_s1 + $0x140] sm:$0xff]  }
   0xc   :  { %988 = vmatpush3.bf16.msra.mxu0 %v1128_v10  ;;  %v1145_v27 = vld [vmem:[%s1515_s1 + $0xb0] sm:$0xff]   ;;  %v1149_v31 = vld [vmem:[%s1515_s1 + $0xb8] sm:$0xff]   ;;  %464 = vmatprep.mubr.bf16.mxu0 %v30_v35  ;;  %v1151_v42 = vld [vmem:[%s1515_s1 + $0x100] sm:$0xff]  }
   0xd   :  { %1010 = vmatpush3.bf16.msra.mxu1 %v1129_v11  ;;  %989 = vmatprep.subr.bf16.mxu0 %v1130_v12  ;;  %v25_v33 = vld [vmem:[%s1514_s0 + $0x18] sm:$0xff]  ;;  %v24_v38 = vld [vmem:[%s1514_s0 + $0x10] sm:$0xff]  ;;  %v1152_v43 = vld [vmem:[%s1515_s1 + $0x148] sm:$0xff]  }
   0xe   :  { %1011 = vmatprep.subr.bf16.mxu1 %v1131_v13  ;;  %v32_v36 = vpack.c.bf16 %v25_v33, %v25_v33  ;;  %v31_v39 = vpack.c.bf16 %v24_v38, %v24_v38  ;;  %v1153_v44 = vld [vmem:[%s1515_s1 + $0x108] sm:$0xff]   ;;  %v1154_v45 = vld [vmem:[%s1515_s1 + $0x150] sm:$0xff]   ;;  %v1156_v47 = vld [vmem:[%s1515_s1 + $0x158] sm:$0xff]  }
   0xf   :  { %v1155_v46 = vld [vmem:[%s1515_s1 + $0x110] sm:$0xff]   ;;  %v1157_v48 = vld [vmem:[%s1515_s1 + $0x118] sm:$0xff]   ;;  %v1158_v49 = vld [vmem:[%s1515_s1 + $0x160] sm:$0xff]  }
  0x10   :  { %990 = vmatpush3.bf16.msra.mxu0 %v1132_v14  ;;  %504 = vmatprep.mubr.bf16.mxu1 %v32_v36  ;;  %v1159_v50 = vld [vmem:[%s1515_s1 + $0x120] sm:$0xff]   ;;  %v1160_v51 = vld [vmem:[%s1515_s1 + $0x168] sm:$0xff]   ;;  %v28_v55 = vld [vmem:[%s1514_s0 + $0x30] sm:$0xff] }
  0x11   :  { %1012 = vmatpush3.bf16.msra.mxu1 %v1133_v15  ;;  %991 = vmatprep.subr.bf16.mxu0 %v1134_v16  ;;  %v1166_v52 = vld [vmem:[%s1515_s1 + $0x180] sm:$0xff]   ;;  %v27_v53 = vld [vmem:[%s1514_s0 + $0x28] sm:$0xff]  ;;  %v35_v57 = vpack.c.bf16 %v28_v55, %v28_v55  ;;  %v1162_v58 = vld [vmem:[%s1515_s1 + $0x170] sm:$0xff]  }
  0x12   :  { %1013 = vmatprep.subr.bf16.mxu1 %v1135_v17  ;;  %v34_v54 = vpack.c.bf16 %v27_v53, %v27_v53  ;;  %v1161_v56 = vld [vmem:[%s1515_s1 + $0x128] sm:$0xff]   ;;  %v1163_v59 = vld [vmem:[%s1515_s1 + $0x130] sm:$0xff]   ;;  %v1164_v60 = vld [vmem:[%s1515_s1 + $0x178] sm:$0xff]  }
  0x13   :  { %v1165_v61 = vld [vmem:[%s1515_s1 + $0x138] sm:$0xff]   ;;  %v26_v62 = vld [vmem:[%s1514_s0 + $0x20] sm:$0xff] }
  0x14   :  { %992 = vmatpush3.bf16.msra.mxu0 %v1136_v18 }
  0x15   :  { %1014 = vmatpush3.bf16.msra.mxu1 %v1137_v19  ;;  %993 = vmatprep.subr.bf16.mxu0 %v1138_v20 }
  0x16   :  { %1015 = vmatprep.subr.bf16.mxu1 %v1139_v21 }
  0x18   :  { %994 = vmatpush3.bf16.msra.mxu0 %v1140_v22 }
  0x19   :  { %1016 = vmatpush3.bf16.msra.mxu1 %v1141_v23  ;;  %995 = vmatprep.subr.bf16.mxu0 %v1142_v24 }
  0x1a   :  { %1017 = vmatprep.subr.bf16.mxu1 %v1143_v25 }
  0x1c   :  { %996 = vmatpush3.bf16.msra.mxu0 %v1144_v26 }
  0x1d   :  { %1018 = vmatpush3.bf16.msra.mxu1 %v1145_v27  ;;  %997 = vmatprep.subr.bf16.mxu0 %v1146_v28 }
  0x1e   :  { %1019 = vmatprep.subr.bf16.mxu1 %v1147_v29 }
  0x20   :  { %998 = vmatpush3.bf16.msra.mxu0 %v1148_v30 }
  0x21   :  { %1020 = vmatpush3.bf16.msra.mxu1 %v1149_v31  ;;  %1027 = vmatprep.subr.bf16.mxu0 %v1150_v40 }
  0x22   :  { %1069 = vmatprep.subr.bf16.mxu1 %v1215_v41 }
  0x23   :  { %465 = vmatmul.mubr.bf16.vlgmr.msra.gmra.mrb[0].mxu0 %v29_v37 }
  0x24   :  { %505 = vmatmul.mubr.bf16.vlgmr.msra.gmra.mrb[0].mxu1 %v31_v39  ;;  %1028 = vmatpush3.bf16.msra.mxu0 %v1151_v42 }
  0x25   :  { %1071 = vmatprep.mubr.msk.bf16.mxu1 %vm1216_vm0, %v1215_v41  ;;  %1029 = vmatprep.subr.bf16.mxu0 %v1152_v43 }
  0x26   :  { %1070 = vmatpush3.bf16.msra.mxu1 %v1166_v52  ;;  %544 = vmatprep.mubr.bf16.mxu0 %v34_v54 }
  0x27   :  { %1075 = vmatprep.subr.bf16.mxu1 %v1215_v41 }
  0x28   :  { %1030 = vmatpush3.bf16.msra.mxu0 %v1153_v44 }
  0x29   :  { %1031 = vmatprep.subr.bf16.mxu0 %v1154_v45 }
  0x2c   :  { %1032 = vmatpush3.bf16.msra.mxu0 %v1155_v46  ;;  %1072 = vmatmul.mubr.msk.bf16.vlgmr.msra.gmra.mrb[4].mxu1 %vm428_vm1, %v35_v57 }
  0x2d   :  { %1033 = vmatprep.subr.bf16.mxu0 %v1156_v47  ;;  %1091 = vmatprep.mubr.msk.bf16.mxu1 %vm1216_vm0, %v1215_v41 }
  0x30   :  { %1034 = vmatpush3.bf16.msra.mxu0 %v1157_v48 }
  0x31   :  { %1035 = vmatprep.subr.bf16.mxu0 %v1158_v49 }
  0x34   :  { %1036 = vmatpush3.bf16.msra.mxu0 %v1159_v50 }
  0x35   :  { %1037 = vmatprep.subr.bf16.mxu0 %v1160_v51 }
  0x38   :  { %1038 = vmatpush3.bf16.msra.mxu0 %v1161_v56 }
  0x39   :  { %1039 = vmatprep.subr.bf16.mxu0 %v1162_v58 }
  0x3c   :  { %1040 = vmatpush3.bf16.msra.mxu0 %v1163_v59 }
  0x3d   :  { %10 = vsyncpa [#allocation3], 0  ;;  %1041 = vmatprep.subr.bf16.mxu0 %v1164_v60  ;;  %v33_v63 = vpack.c.bf16 %v26_v62, %v26_v62  ;;  %v1167_v0 = vld [vmem:[%s1516_s2] sm:$0xff]   ;;  %v1168_v1 = vld [vmem:[%s1516_s2 + $0x8] sm:$0xff]  }
  0x3e   :  { %1076 = vmatpush3.bf16.msra.mxu1 %v1167_v0  ;;  %v1169_v2 = vld [vmem:[%s1516_s2 + $0x10] sm:$0xff]   ;;  %v1170_v3 = vld [vmem:[%s1516_s2 + $0x18] sm:$0xff]   ;;  %v1171_v4 = vld [vmem:[%s1516_s2 + $0x20] sm:$0xff]  }
  0x3f   :  { %1077 = vmatprep.subr.bf16.mxu1 %v1215_v41  ;;  %v1172_v5 = vld [vmem:[%s1516_s2 + $0x28] sm:$0xff]   ;;  %v1173_v6 = vld [vmem:[%s1516_s2 + $0x30] sm:$0xff]   ;;  %v1174_v7 = vld [vmem:[%s1516_s2 + $0x38] sm:$0xff]  }
  0x40   :  { %1042 = vmatpush3.bf16.msra.mxu0 %v1165_v61  ;;  %v962_v52 = vld [vmem:[%s1518_s4] ss:$0 sm:$0xff]  ;;  %v963_v54 = vld [vmem:[%s1518_s4 + $0x1] ss:$0 sm:$0xff]  ;;  %v1176_v60 = vld [vmem:[%s1517_s3 + $0x8] sm:$0xff]  }
  0x41   :  { %1095 = vmatprep.subr.bf16.mxu0 %v1215_v41  ;;  %v1175_v59 = vld [vmem:[%s1517_s3] sm:$0xff]   ;;  %v1177_v61 = vld [vmem:[%s1517_s3 + $0x10] sm:$0xff]   ;;  %v1178_v62 = vld [vmem:[%s1517_s3 + $0x18] sm:$0xff]  }
  0x42   :  { %1078 = vmatpush3.bf16.msra.mxu1 %v1168_v1  ;;  %v1180_v0 = vld [vmem:[%s1517_s3 + $0x28] sm:$0xff]   ;;  %v1181_v1 = vld [vmem:[%s1517_s3 + $0x30] sm:$0xff]  }
  0x43   :  { %545 = vmatmul.mubr.bf16.vlgmr.msra.gmra.mrb[4].mxu0 %v33_v63  ;;  %1079 = vmatprep.subr.bf16.mxu1 %v1215_v41  ;;  %v1179_v63 = vld [vmem:[%s1517_s3 + $0x20] sm:$0xff]  }
  0x44   :  { %1111 = vmatprep.mubr.msk.bf16.mxu0 %vm1216_vm0, %v1215_v41  ;;  %1096 = vmatpush3.bf16.msra.mxu0 %v1175_v59 }
  0x45   :  { %1097 = vmatprep.subr.bf16.mxu0 %v1215_v41 }
  0x46   :  { %1080 = vmatpush3.bf16.msra.mxu1 %v1169_v2  ;;  %v1182_v2 = vld [vmem:[%s1517_s3 + $0x38] sm:$0xff]  }
  0x47   :  { %1081 = vmatprep.subr.bf16.mxu1 %v1215_v41 }
  0x48   :  { %1098 = vmatpush3.bf16.msra.mxu0 %v1176_v60 }
  0x49   :  { %1099 = vmatprep.subr.bf16.mxu0 %v1215_v41 }
  0x4a   :  { %1082 = vmatpush3.bf16.msra.mxu1 %v1170_v3 }
  0x4b   :  { %1083 = vmatprep.subr.bf16.mxu1 %v1215_v41 }
  0x4c   :  { %1100 = vmatpush3.bf16.msra.mxu0 %v1177_v61 }
  0x4d   :  { %1101 = vmatprep.subr.bf16.mxu0 %v1215_v41 }
  0x4e   :  { %1084 = vmatpush3.bf16.msra.mxu1 %v1171_v4 }
  0x4f   :  { %1085 = vmatprep.subr.bf16.mxu1 %v1215_v41 }
  0x50   :  { %1102 = vmatpush3.bf16.msra.mxu0 %v1178_v62 }
  0x51   :  { %1103 = vmatprep.subr.bf16.mxu0 %v1215_v41 }
  0x52   :  { %1086 = vmatpush3.bf16.msra.mxu1 %v1172_v5 }
  0x53   :  { %1087 = vmatprep.subr.bf16.mxu1 %v1215_v41 }
  0x54   :  { %1104 = vmatpush3.bf16.msra.mxu0 %v1179_v63 }
  0x55   :  { %1105 = vmatprep.subr.bf16.mxu0 %v1215_v41 }
  0x56   :  { %1088 = vmatpush3.bf16.msra.mxu1 %v1173_v6 }
  0x57   :  { %1089 = vmatprep.subr.bf16.mxu1 %v1215_v41 }
  0x58   :  { %1106 = vmatpush3.bf16.msra.mxu0 %v1180_v0 }
  0x59   :  { %1107 = vmatprep.subr.bf16.mxu0 %v1215_v41 }
  0x5a   :  { %1090 = vmatpush3.bf16.msra.mxu1 %v1174_v7 }
  0x5c   :  { %1108 = vmatpush3.bf16.msra.mxu0 %v1181_v1 }
  0x5d   :  { %1109 = vmatprep.subr.bf16.mxu0 %v1215_v41 }
  0x60   :  { %1110 = vmatpush3.bf16.msra.mxu0 %v1182_v2 }
  0xf6   :  { %v999_v8 = vpop.f32.mrb[0].mxu0 }
  0xf7   :  { %v1021_v9 = vpop.f32.mrb[0].mxu1  ;;  %v1000_v10 = vpop.f32.mrb[1].mxu0 }
  0xf8   :  { %v1022_v11 = vpop.f32.mrb[1].mxu1  ;;  %v1001_v12 = vadd.f32 %v1000_v10, %v999_v8  ;;  %v1002_v14 = vpop.f32.mrb[2].mxu0 }
  0xf9   :  { %v1023_v13 = vadd.f32 %v1022_v11, %v1021_v9  ;;  %v1024_v15 = vpop.f32.mrb[2].mxu1  ;;  %v1003_v16 = vpop.f32.mrb[3].mxu0 }
  0xfa   :  { %v1025_v17 = vpop.f32.mrb[3].mxu1 }
  0xfb   :  { %v507_v18 = vadd.f32 %v1023_v13, %v1001_v12 }
  0xff   :  { %v586_v19 = vpop.f32.mrb[4].mxu1 }
 0x100   :  { %v1073_v20 = vpop.f32.mrb[5].mxu1 }
 0x101   :  { %v589_v21 = vpop.f32.mrb[6].mxu1 }
 0x102   :  { %v1074_v22 = vpop.f32.mrb[7].mxu1 }
 0x116   :  { %v1043_v23 = vpop.f32.mrb[4].mxu0 }
 0x117   :  { %v1044_v24 = vpop.f32.mrb[5].mxu0 }
 0x118   :  { %v1045_v25 = vadd.f32 %v1044_v24, %v1043_v23  ;;  %v1046_v26 = vpop.f32.mrb[6].mxu0 }
 0x119   :  { %v1047_v27 = vpop.f32.mrb[7].mxu0 }
 0x11a   :  { %v547_v28 = vadd.f32 %v1045_v25, %v507_v18  ;;  %v972_v27 = vld [vmem:[%s1518_s4 + $0x2] ss:$0 sm:$0xff] }
 0x11c   :  { %v587_v29 = vadd.f32 %v586_v19, %v547_v28 }
 0x11e   :  { %v594_v30 = vrot.slane %v587_v29, 4  ;;  %v602_v31 = vmul.f32 %v587_v29, %v587_v29 }
 0x120   :  { %v595_v32 = vadd.f32 %v594_v30, %v587_v29  ;;  %v603_v33 = vrot.slane %v602_v31, 4 }
 0x122   :  { %v596_v34 = vrot.slane %v595_v32, 2  ;;  %v604_v35 = vadd.f32 %v603_v33, %v602_v31 }
 0x124   :  { %v597_v36 = vadd.f32 %v596_v34, %v595_v32  ;;  %v605_v37 = vrot.slane %v604_v35, 2  ;;  %v974_v34 = vld [vmem:[%s1518_s4 + $0x4] ss:$0 sm:$0xff] }
 0x126   :  { %v598_v38 = vrot.slane %v597_v36, 1  ;;  %v606_v39 = vadd.f32 %v605_v37, %v604_v35 }
 0x128   :  { %v599_v40 = vadd.f32 %v598_v38, %v597_v36  ;;  %v607_v42 = vrot.slane %v606_v39, 1 }
 0x12a   :  { %v601_v43 = vmul.f32 0.125, %v599_v40  ;;  %v608_v44 = vadd.f32 %v607_v42, %v606_v39 }
 0x12c   :  { %v609_v45 = vmul.f32 0.125, %v608_v44  ;;  %v610_v46 = vmul.f32 %v601_v43, %v601_v43  ;;  %v613_v50 = vsub.f32 %v587_v29, %v601_v43  ;;  %v973_v29 = vld [vmem:[%s1518_s4 + $0x3] ss:$0 sm:$0xff]  ;;  %s1217_s4 = smov [#allocation2]  }
 0x12d   :  { %s904_s16 = sshll.u32 %s1217_s4, 4  ;;  %s905_s16 = int_to_ptr.vmem [resolvable:$true] %s904_s16 }
 0x12e   :  { %v611_v47 = vsub.f32 %v609_v45, %v610_v46  ;;  %s1191_s17 = scalar_lea.vmem %s905_s16, 128  ;;  %p1196_p1 = scmp.lt.s32.totalorder %s905_s16, %s905_s16 }
 0x12f   :  { %p1192_p0 = scmp.ne.s32.totalorder %s905_s16, %s1191_s17  ;;  %p1197_p2 = scmp.lt.s32.totalorder %s1191_s17, %s1191_s17 }
 0x130   :  { %v612_v48 = vmax.f32 %v611_v47, 0.0 }
 0x131   :  { %p1198_p3 = por %p1197_p2, %p1196_p1 }
 0x132   :  { %v614_v49 = vadd.f32 1e-05, %v612_v48 }
 0x133   :  { %p1199_p4 = pnand %p1198_p3, %p1192_p0 }
 0x134   :  { %1183 = vrsqrt.f32 %v614_v49 }
 0x13e   :  { %v1184_v51 = vpop.eup %1183 }
 0x13f   :  { %v616_v53 = vmul.f32 %v1184_v51, %v613_v50 }
 0x141   :  { %v621_v55 = vmul.f32 %v962_v52, %v616_v53 }
 0x143   :  { %v626_v56 = vadd.f32 %v963_v54, %v621_v55 }
 0x145   :  { %v627_v57 = vmax.f32 %v626_v56, 0.0 }
 0x147   :  { %v628_v58 = vpack.c.bf16 %v627_v57, %v627_v57 }
 0x149   :  { %1092 = vmatmul.mubr.bf16.vlgmr.msra.gmra.mrb[8].mxu1 %v628_v58 }
 0x21c   :  { %v727_v3 = vpop.f32.mrb[8].mxu1 }
 0x21d   :  { %v735_v4 = vrot.slane %v727_v3, 4  ;;  %v742_v5 = vmul.f32 %v727_v3, %v727_v3  ;;  %v1093_v6 = vpop.f32.mrb[9].mxu1 }
 0x21e   :  { %v730_v7 = vpop.f32.mrb[10].mxu1 }
 0x21f   :  { %v736_v8 = vadd.f32 %v735_v4, %v727_v3  ;;  %v743_v9 = vrot.slane %v742_v5, 4  ;;  %v1094_v10 = vpop.f32.mrb[11].mxu1 }
 0x221   :  { %v737_v11 = vrot.slane %v736_v8, 2  ;;  %v744_v12 = vadd.f32 %v743_v9, %v742_v5 }
 0x223   :  { %v738_v13 = vadd.f32 %v737_v11, %v736_v8  ;;  %v745_v14 = vrot.slane %v744_v12, 2 }
 0x225   :  { %v739_v15 = vrot.slane %v738_v13, 1  ;;  %v746_v16 = vadd.f32 %v745_v14, %v744_v12 }
 0x227   :  { %v740_v17 = vadd.f32 %v739_v15, %v738_v13  ;;  %v747_v18 = vrot.slane %v746_v16, 1 }
 0x229   :  { %v741_v19 = vmul.f32 0.125, %v740_v17  ;;  %v748_v20 = vadd.f32 %v747_v18, %v746_v16 }
 0x22b   :  { %v749_v41 = vmul.f32 0.125, %v748_v20  ;;  %v750_v21 = vmul.f32 %v741_v19, %v741_v19  ;;  %v753_v25 = vsub.f32 %v727_v3, %v741_v19 }
 0x22d   :  { %v751_v22 = vsub.f32 %v749_v41, %v750_v21 }
 0x22f   :  { %v752_v23 = vmax.f32 %v751_v22, 0.0 }
 0x231   :  { %v754_v24 = vadd.f32 1e-05, %v752_v23 }
 0x233   :  { %1185 = vrsqrt.f32 %v754_v24 }
 0x23d   :  { %v1186_v26 = vpop.eup %1185 }
 0x23e   :  { %v756_v28 = vmul.f32 %v1186_v26, %v753_v25 }
 0x240   :  { %v761_v30 = vmul.f32 %v972_v27, %v756_v28 }
 0x242   :  { %v766_v31 = vadd.f32 %v973_v29, %v761_v30 }
 0x244   :  { %v767_v32 = vmax.f32 %v766_v31, 0.0 }
 0x246   :  { %v768_v33 = vpack.c.bf16 %v767_v32, %v767_v32 }
 0x248   :  { %1112 = vmatmul.mubr.bf16.vlgmr.msra.gmra.mrb[8].mxu0 %v768_v33 }
 0x31b   :  { %v872_v35 = vpop.f32.mrb[8].mxu0 }
 0x31c   :  { %v873_v36 = vadd.f32 %v974_v34, %v872_v35  ;;  %v1113_v37 = vpop.f32.mrb[9].mxu0 }
 0x31d   :  { %v875_v38 = vpop.f32.mrb[10].mxu0 }
 0x31e   :  { %v878_v39 = vrot.slane %v873_v36, 4  ;;  %v1114_v40 = vpop.f32.mrb[11].mxu0 }
 0x320   :  { %v879_v42 = vmax.f32 %v873_v36, %v878_v39 }
 0x322   :  { %v880_v43 = vrot.slane %v879_v42, 2 }
 0x324   :  { %v881_v44 = vmax.f32 %v879_v42, %v880_v43 }
 0x326   :  { %v882_v45 = vrot.slane %v881_v44, 1 }
 0x328   :  { %v883_v46 = vmax.f32 %v881_v44, %v882_v45 }
 0x32a   :  { %v884_v47 = vsub.f32 %v873_v36, %v883_v46 }
 0x32c   :  { %v885_v48 = vmul.f32 1.442695, %v884_v47 }
 0x32e   :  { %1187 = vpow2.f32 %v885_v48 }
 0x338   :  { %v1188_v49 = vpop.eup %1187 }
 0x339   :  { %v887_v50 = vrot.slane %v1188_v49, 4 }
 0x33b   :  { %v888_v51 = vadd.f32 %v1188_v49, %v887_v50 }
 0x33d   :  { %v889_v52 = vrot.slane %v888_v51, 2 }
 0x33f   :  { %v890_v53 = vadd.f32 %v889_v52, %v888_v51 }
 0x341   :  { %v891_v54 = vrot.slane %v890_v53, 1 }
 0x343   :  { %v892_v55 = vadd.f32 %v891_v54, %v890_v53 }
 0x345   :  { %1189 = vlog2.f32 %v892_v55 }
 0x34f   :  { %v1190_v56 = vpop.eup %1189 }
 0x350   :  { %v894_v57 = vmul.f32 0.6931472, %v1190_v56 }
 0x352   :  { %v895_v58 = vadd.f32 %v894_v57, %v883_v46 }
 0x354   :  { %v896_v59 = vsub.f32 %v873_v36, %v895_v58 }
 0x356   :  { %897 = vst [vmem:[#allocation2] sm:$0xff] %v896_v59 }
 0x357   :  { %1202 = shalt.err (!%p1199_p4)
}
 0x358   :  { %s1203_s19 = scalar_lea.hbm %s1519_s5, 128 }
 0x359   :  { %p1204_p5 = scmp.ne.s32.totalorder %s1519_s5, %s1203_s19  ;;  %p1207_p6 = scmp.lt.u32.totalorder %s1203_s19, %s1519_s5 }
 0x35b   :  { %p1209_p7 = pnand %p1207_p6, %p1204_p5 }
 0x35d   :  { %1212 = shalt.err (!%p1209_p7)
}
 0x35e   :  { %907 = dma.vmem_to_hbm [thread:$0]  %s905_s16, 128, %s1519_s5, [#allocation3]  }
 0x35f   :  { %1213 = dma.done.wait [#allocation3], 128  }
 0x360   :  { %1214 = vsyncadd [#allocation3], 4294967168 }
 0x361   :  { %911 = vsyncpa [#allocation3], 1 }

</bundles_post_ra>
